<compile_context>
chip_gen: v6e
topology: v6e:2x2x1
jax: 0.10.0
libtpu: 0.0.40
codegen_flags: <defaults>
</compile_context>

<pallas_src>
import functools

import jax
import jax.numpy as jnp
from jax.experimental import pallas as pl
from jax.experimental.pallas import tpu as pltpu


def _maxpool_stride1_kernel(x_ref, o_ref, *, kernel_size: int, H: int, W: int):
    """One block of planes, flattened lane-dense as (Cb, H*W).

    Separable stride-1 k x k max with the window clamped at the right/bottom
    edge (equivalent to replicate padding).  Column indices come from a lane
    iota; row shifts are contiguous ranges of the flat axis, so the H-pass is
    two partial maxima on o_ref slices and needs no shifted temporaries.
    """
    x = x_ref[...]                                    # (Cb, H*W)
    Cb, HW = x.shape
    k = kernel_size

    col = jax.lax.broadcasted_iota(jnp.int32, (Cb, HW), 1) % W

    # ---- pass 1: max over columns w .. min(w+k-1, W-1), within each row -----
    o_ref[...] = x
    for j in range(1, min(k, W)):
        m = HW - j
        # candidate[f] = x[f + j] where column w+j stays inside the row;
        # otherwise the (already included) unshifted value, which cannot win.
        cand = jnp.where(col[:, :m] < W - j, x[:, j:], x[:, :m])
        o_ref[:, :m] = jnp.maximum(o_ref[:, :m], cand)

    # ---- pass 2: max over rows h .. min(h+k-1, H-1) --------------------------
    col_max = o_ref[...]
    for i in range(1, min(k, H)):
        n = (H - i) * W                               # rows 0 .. H-i-1 see row h+i
        o_ref[:, :n] = jnp.maximum(o_ref[:, :n], col_max[:, i * W:])
    # NOTE: for kernel_size >= 4 a log2(k) (van Herk / Gil-Werman) doubling max
    # would cut the shift count per axis; unnecessary for k in {2, 3}.


def _round_up(a: int, b: int) -> int:
    return -(-a // b) * b


def _sublane(dtype) -> int:
    # (sublane, lane) tiling: 32-bit packs 8 rows per tile, 16-bit 16, 8-bit 32.
    return {4: 8, 2: 16, 1: 32}.get(jnp.dtype(dtype).itemsize, 8)


def _tpu_limits():
    """(usable VMEM capacity bytes, TensorCores per chip) with safe fallbacks."""
    kind = ""
    try:
        kind = jax.devices()[0].device_kind.lower()
    except Exception:
        pass
    cap = 0
    try:
        cap = int(getattr(pltpu.get_tpu_info(), "vmem_capacity_bytes", 0) or 0)
    except Exception:
        cap = 0
    if cap <= 0:
        cap = (128 << 20) if ("v5" in kind or "v6" in kind) else (64 << 20)
    num_tc = 1
    if "7" in kind:                      # v7x: 2 TensorCores, 64 MiB VMEM per TC
        num_tc = 2
        cap = min(cap, 64 << 20)
    return cap, num_tc


def _choose_block_planes(P: int, HW: int, dtype, vmem_limit: int, num_tc: int) -> int:
    """Planes per grid step: as large as the padded-VMEM budget allows."""
    itemsize = jnp.dtype(dtype).itemsize
    sub = _sublane(dtype)
    lane_bytes = _round_up(HW, 128) * itemsize        # one plane row, lane-padded
    # Live block-sized buffers: 2 in + 2 out pipeline copies, ~3 value temps,
    # plus the int32 column-iota mask.
    per_plane = 7 * lane_bytes + _round_up(HW, 128) * 4
    budget_planes = max(1, int(vmem_limit) // per_plane)

    if P <= budget_planes:
        cb = P                                        # whole problem in one block
    else:
        # Blocks of full (sub, 128) tiles (keeps the block_shape tiling rule and
        # unmasked stores); the ragged last block's writeback is masked by Pallas.
        cb = max(sub, (budget_planes // sub) * sub)

    # v7x shares the "parallel" grid axis across two TensorCores: keep the step
    # count a multiple of 2 when blocks stay tile-aligned.  On v5e/v6e (one TC)
    # a single maximal block amortizes the ~0.35us/step overhead best.
    if num_tc > 1 and P >= 2 * sub:
        steps = -(-P // cb)
        if steps % num_tc:
            for target in range(steps + 1, steps + 4 * num_tc + 1):
                c = _round_up(-(-P // target), sub)
                if c <= cb and (-(-P // c)) % num_tc == 0:
                    cb = c
                    break
    return cb


def maxpool_stride1(x: jax.Array, kernel_size: int = 2) -> jax.Array:
    """Pallas equivalent of MaxPoolStride1.forward for NCHW input."""
    N, C, H, W = x.shape
    P, HW = N * C, H * W
    xr = x.reshape(P, HW)                             # free reshape; lane axis = H*W
    itemsize = x.dtype.itemsize

    cap, num_tc = _tpu_limits()
    vmem_limit = int(min(max(3 * cap // 4, 32 << 20), 96 << 20))
    cb = _choose_block_planes(P, HW, x.dtype, vmem_limit, num_tc)
    grid = (pl.cdiv(P, cb),)

    kernel = functools.partial(_maxpool_stride1_kernel,
                               kernel_size=kernel_size, H=H, W=W)
    cost = pl.CostEstimate(
        flops=int(max(min(kernel_size, H) - 1, 0) * P * HW
                  + max(min(kernel_size, W) - 1, 0) * P * HW),
        transcendentals=0,
        bytes_accessed=int(2 * P * HW * itemsize),
    )

    out = pl.pallas_call(
        kernel,
        out_shape=jax.ShapeDtypeStruct((P, HW), x.dtype),
        grid=grid,
        in_specs=[pl.BlockSpec((cb, HW), lambda i: (i, 0))],
        out_specs=pl.BlockSpec((cb, HW), lambda i: (i, 0)),
        compiler_params=pltpu.CompilerParams(
            dimension_semantics=("parallel",),
            vmem_limit_bytes=vmem_limit,
        ),
        cost_estimate=cost,
    )(xr)

    return out.reshape(N, C, H, W)


def _reference_maxpool_stride1(x: jax.Array, kernel_size: int = 2) -> jax.Array:
    """Pure-JAX reference matching F.pad(..., mode='replicate') + max_pool2d(k, stride=1)."""
    pad = kernel_size - 1
    xp = jnp.pad(x, ((0, 0), (0, 0), (0, pad), (0, pad)), mode="edge")
    N, C, H, W = x.shape
    out = None
    for i in range(kernel_size):
        for j in range(kernel_size):
            win = xp[:, :, i:i + H, j:j + W]
            out = win if out is None else jnp.maximum(out, win)
    return out


if __name__ == "__main__":
    key = jax.random.PRNGKey(0)
    N, C, H, W = 2, 4, 16, 16
    x = jax.random.normal(key, (N, C, H, W), dtype=jnp.float32)

    # kernel_size=2 (the module default)
    y = jax.block_until_ready(maxpool_stride1(x, kernel_size=2))
    y_ref = _reference_maxpool_stride1(x, kernel_size=2)
    assert y.shape == x.shape, (y.shape, x.shape)
    assert jnp.allclose(y, y_ref, atol=1e-6, rtol=1e-6), "mismatch vs reference (k=2)"

    # kernel_size=3 exercises the multi-shift separable path
    y3 = jax.block_until_ready(maxpool_stride1(x, kernel_size=3))
    y3_ref = _reference_maxpool_stride1(x, kernel_size=3)
    assert jnp.allclose(y3, y3_ref, atol=1e-6, rtol=1e-6), "mismatch vs reference (k=3)"

    print("KERNEL_OK")
</pallas_src>

<mosaic_0001>
module attributes {stable_mosaic.version = 11 : i64} {
  func.func @_maxpool_stride1_kernel(%arg0: i32, %arg1: memref<8x256xf32, #tpu.memory_space<vmem>>, %arg2: memref<8x256xf32, #tpu.memory_space<vmem>>) attributes {dimension_semantics = [#tpu.dimension_semantics<parallel>], iteration_bounds = array<i64: 1>, scalar_prefetch = 0 : i64, scratch_operands = 0 : i64, tpu.core_type = #tpu.core_type<tc>, window_params = [{transform_indices = @transform_0, window_bounds = array<i64: 8, 256>}, {transform_indices = @transform_1, window_bounds = array<i64: 8, 256>}]} {
    %c0 = arith.constant 0 : index
    %c0_0 = arith.constant 0 : index
    %0 = vector.load %arg1[%c0, %c0_0] : memref<8x256xf32, #tpu.memory_space<vmem>>, vector<8x256xf32>
    %1 = tpu.iota {dimensions = array<i32: 1>} : vector<8x256xi32>
    %c16_i32 = arith.constant 16 : i32
    %c0_i32 = arith.constant 0 : i32
    %2 = arith.cmpi eq, %c16_i32, %c0_i32 : i32
    %c1_i32 = arith.constant 1 : i32
    %3 = arith.select %2, %c1_i32, %c16_i32 : i32
    %4 = vector.broadcast %3 : i32 to vector<8x256xi32>
    %5 = arith.remsi %1, %4 : vector<8x256xi32>
    %c0_i32_1 = arith.constant 0 : i32
    %6 = vector.broadcast %c0_i32_1 : i32 to vector<8x256xi32>
    %7 = arith.cmpi ne, %5, %6 : vector<8x256xi32>
    %c0_i32_2 = arith.constant 0 : i32
    %8 = vector.broadcast %c0_i32_2 : i32 to vector<8x256xi32>
    %9 = arith.cmpi slt, %5, %8 : vector<8x256xi32>
    %c0_i32_3 = arith.constant 0 : i32
    %10 = arith.cmpi slt, %3, %c0_i32_3 : i32
    %11 = vector.broadcast %10 : i1 to vector<8x256xi1>
    %12 = vector.broadcast %11 : vector<8x256xi1> to vector<8x256xi1>
    %13 = arith.xori %9, %12 : vector<8x256xi1>
    %14 = arith.andi %13, %7 : vector<8x256xi1>
    %15 = vector.broadcast %3 : i32 to vector<8x256xi32>
    %16 = arith.addi %5, %15 : vector<8x256xi32>
    %17 = arith.select %14, %16, %5 : vector<8x256xi1>, vector<8x256xi32>
    %c0_4 = arith.constant 0 : index
    %c0_5 = arith.constant 0 : index
    %18 = vector.load %arg2[%c0_4, %c0_5] : memref<8x256xf32, #tpu.memory_space<vmem>>, vector<8x256xf32>
    tpu.vector_store %arg2[%c0_4, %c0_5], %0 {strides = array<i32>} : memref<8x256xf32, #tpu.memory_space<vmem>>, vector<8x256xf32>,
    %19 = vector.extract_strided_slice %17 {offsets = [0, 0], sizes = [8, 255], strides = [1, 1]} : vector<8x256xi32> to vector<8x255xi32>
    %c15_i32 = arith.constant 15 : i32
    %20 = vector.broadcast %c15_i32 : i32 to vector<8x255xi32>
    %21 = arith.cmpi slt, %19, %20 : vector<8x255xi32>
    %22 = vector.extract_strided_slice %0 {offsets = [0, 1], sizes = [8, 255], strides = [1, 1]} : vector<8x256xf32> to vector<8x255xf32>
    %23 = vector.extract_strided_slice %0 {offsets = [0, 0], sizes = [8, 255], strides = [1, 1]} : vector<8x256xf32> to vector<8x255xf32>
    %24 = arith.select %21, %22, %23 : vector<8x255xi1>, vector<8x255xf32>
    %c0_6 = arith.constant 0 : index
    %c0_7 = arith.constant 0 : index
    %25 = vector.load %arg2[%c0_6, %c0_7] : memref<8x256xf32, #tpu.memory_space<vmem>>, vector<8x255xf32>
    %26 = arith.maximumf %25, %24 : vector<8x255xf32>
    %c0_8 = arith.constant 0 : index
    %c0_9 = arith.constant 0 : index
    %27 = vector.load %arg2[%c0_8, %c0_9] : memref<8x256xf32, #tpu.memory_space<vmem>>, vector<8x255xf32>
    tpu.vector_store %arg2[%c0_8, %c0_9], %26 {strides = array<i32>} : memref<8x256xf32, #tpu.memory_space<vmem>>, vector<8x255xf32>,
    %c0_10 = arith.constant 0 : index
    %c0_11 = arith.constant 0 : index
    %28 = vector.load %arg2[%c0_10, %c0_11] : memref<8x256xf32, #tpu.memory_space<vmem>>, vector<8x256xf32>
    %c0_12 = arith.constant 0 : index
    %c0_13 = arith.constant 0 : index
    %29 = vector.load %arg2[%c0_12, %c0_13] : memref<8x256xf32, #tpu.memory_space<vmem>>, vector<8x240xf32>
    %30 = vector.extract_strided_slice %28 {offsets = [0, 16], sizes = [8, 240], strides = [1, 1]} : vector<8x256xf32> to vector<8x240xf32>
    %31 = arith.maximumf %29, %30 : vector<8x240xf32>
    %c0_14 = arith.constant 0 : index
    %c0_15 = arith.constant 0 : index
    %32 = vector.load %arg2[%c0_14, %c0_15] : memref<8x256xf32, #tpu.memory_space<vmem>>, vector<8x240xf32>
    tpu.vector_store %arg2[%c0_14, %c0_15], %31 {strides = array<i32>} : memref<8x256xf32, #tpu.memory_space<vmem>>, vector<8x240xf32>,
    return
  }
  func.func @transform_0(%arg0: i32) -> (i32, i32) {
    %c0_i32 = arith.constant 0 : i32
    %c0_i32_0 = arith.constant 0 : i32
    return %arg0, %c0_i32 : i32, i32
  }
  func.func @transform_1(%arg0: i32) -> (i32, i32) {
    %c0_i32 = arith.constant 0 : i32
    %c0_i32_0 = arith.constant 0 : i32
    return %arg0, %c0_i32 : i32, i32
  }
}

</mosaic_0001>

<bundles_post_ra>
// kernel: tpu_custom_call.1
= control target key start
LH: loop header
LB: loop body
LE: loop exit
PB: predicated region body
PF: predicated region fallthrough
CT: control target
= control target key end

     0   :  { %6 = vsyncpa [#allocation3], 0  ;;  %s171_s0 = inlined_call_operand.hbm [shape: f32[8,256], index: 0, kind: input, shape index: {}]   ;;  %s172_s1 = inlined_call_operand.hbm [shape: f32[8,256], index: 1, kind: output, shape index: {}]  }
   0x1   :  { %7 = vsyncpa [#allocation4], 0  ;;  %s151_s6 = smov [#allocation2]  }
   0x2   :  { %s14_s7 = sshll.u32 %s151_s6, 4  ;;  %s15_s7 = int_to_ptr.vmem [resolvable:$true] %s14_s7 }
   0x3   :  { %s115_s8 = scalar_lea.vmem %s15_s7, 256  ;;  %p120_p1 = scmp.lt.s32.totalorder %s15_s7, %s15_s7 }
   0x4   :  { %p116_p0 = scmp.ne.s32.totalorder %s15_s7, %s115_s8  ;;  %p121_p2 = scmp.lt.s32.totalorder %s115_s8, %s115_s8 }
   0x6   :  { %p122_p3 = por %p121_p2, %p120_p1 }
   0x8   :  { %p123_p4 = pnand %p122_p3, %p116_p0 }
   0xa   :  { %126 = shalt.err (!%p123_p4)
}
   0xb   :  { %17 = dma.hbm_to_vmem [thread:$0]  %s171_s0, 256, %s15_s7, [#allocation3]  }
   0xc   :  { %147 = dma.done.wait [#allocation3], 256  }
   0xd   :  { %148 = vsyncadd [#allocation3], 4294967040  ;;  %v21_v0 = vld [vmem:[#allocation2] sm:$0xff]  ;;  %v22_v1 = vld [vmem:[#allocation2 + $0x8] sm:$0xff]  ;;  %s152_s11 = smov 127   ;;  %v23_v2 = vlaneseq  ;;  %vm60_vm1 = vcmask 1039360  }
   0xe   :  { %56 = vrot.lane.b32.xlu0 %v21_v0, %s152_s11  ;;  %51 = vst [vmem:[#allocation5 + $0x8] sm:$0xff] %v22_v1  ;;  %s153_s0 = smov 112   ;;  %vm80_vm3 = vcmask 916480   ;;  %s154_s12 = smov [#allocation5]  }
   0xf   :  { %v24_v3 = vand.u32 127, %v23_v2  ;;  %s94_s13 = sshll.u32 %s154_s12, 4  ;;  %s95_s13 = int_to_ptr.vmem [resolvable:$true] %s94_s13 }
  0x10   :  { %s127_s14 = scalar_lea.vmem %s95_s13, 256  ;;  %p132_p6 = scmp.lt.s32.totalorder %s95_s13, %s95_s13 }
  0x11   :  { %v25_v4 = vadd.s32 128, %v24_v3  ;;  %v30_v6 = vand.u32 15, %v24_v3  ;;  %p128_p5 = scmp.ne.s32.totalorder %s95_s13, %s127_s14  ;;  %p133_p7 = scmp.lt.s32.totalorder %s127_s14, %s127_s14 }
  0x12   :  { %58 = vrot.lane.b32.xlu0 %v22_v1, %s152_s11 }
  0x13   :  { %v37_v5 = vand.u32 15, %v25_v4  ;;  %vm52_vm2 = vcmp.lt.s32.totalorder %v30_v6, 15  ;;  %p134_p8 = por %p133_p7, %p132_p6 }
  0x15   :  { %vm53_vm0 = vcmp.lt.s32.totalorder %v37_v5, 15  ;;  %p135_p9 = pnand %p134_p8, %p128_p5 }
  0x80   :  { %v57_v7 = vpop.permute.xlu0 %56 }
  0x84   :  { %v59_v8 = vpop.permute.xlu0 %58 }
  0x85   :  { %v61_v9 = vsel %vm60_vm1, %v57_v7, %v59_v8  ;;  %v65_v10 = vsel %vm53_vm0, %v59_v8, %v22_v1 }
  0x86   :  { %v64_v11 = vsel %vm52_vm2, %v61_v9, %v21_v0  ;;  %v69_v12 = vmax.f32 %v22_v1, %v65_v10 }
  0x87   :  { %v68_v13 = vmax.f32 %v21_v0, %v64_v11 }
  0x88   :  { %71 = vst.msk [vmem:[#allocation5 + $0x8] sm:$0xff] %vm60_vm1, %v69_v12 }
  0x89   :  { %76 = vrot.lane.b32.xlu1 %v68_v13, %s153_s0 }
  0x8f   :  { %v73_v14 = vld [vmem:[#allocation5 + $0x8] sm:$0xff] }
  0x90   :  { %78 = vrot.lane.b32.xlu1 %v73_v14, %s153_s0 }
  0xfb   :  { %v77_v15 = vpop.permute.xlu1 %76 }
 0x102   :  { %v79_v16 = vpop.permute.xlu1 %78 }
 0x103   :  { %v81_v17 = vsel %vm80_vm3, %v77_v15, %v79_v16  ;;  %v85_v18 = vmax.f32 %v73_v14, %v79_v16 }
 0x104   :  { %v84_v19 = vmax.f32 %v68_v13, %v81_v17 }
 0x105   :  { %87 = vst.msk [vmem:[#allocation5 + $0x8] sm:$0xff] %vm80_vm3, %v85_v18 }
 0x106   :  { %86 = vst [vmem:[#allocation5] sm:$0xff] %v84_v19 }
 0x107   :  { %138 = shalt.err (!%p135_p9)
}
 0x108   :  { %97 = dma.vmem_to_hbm [thread:$0]  %s95_s13, 256, %s172_s1, [#allocation4]  }
 0x109   :  { %149 = dma.done.wait [#allocation4], 256  }
 0x10a   :  { %150 = vsyncadd [#allocation4], 4294967040 }
 0x10b   :  { %101 = vsyncpa [#allocation3], 1 }
 0x10c   :  { %102 = vsyncpa [#allocation4], 1 }

</bundles_post_ra>
